<compile_context>
chip_gen: v6e
topology: v6e:2x2x1
jax: 0.10.0
libtpu: 0.0.40
codegen_flags: <defaults>
</compile_context>

<pallas_src>
import jax
import jax.numpy as jnp
from jax.experimental import pallas as pl
from jax.experimental.pallas import tpu as pltpu

ROWS_PER_STEP = 8  # full (8, 128) f32 sublane tile per grid step


def build_pe_matrix(dimension: int, max_timesteps: int = 10000) -> jnp.ndarray:
    """Reproduces TransformerPositionalEmbedding.__init__ (the pe_matrix buffer)."""
    assert dimension % 2 == 0, "Embedding dimension must be even"
    even_indices = jnp.arange(0, dimension, 2, dtype=jnp.float32)
    log_term = jnp.log(jnp.float32(max_timesteps)) / dimension
    div_term = jnp.exp(even_indices * -log_term)
    timesteps = jnp.arange(max_timesteps, dtype=jnp.float32)[:, None]
    pe = jnp.zeros((max_timesteps, dimension), dtype=jnp.float32)
    pe = pe.at[:, 0::2].set(jnp.sin(timesteps * div_term))
    pe = pe.at[:, 1::2].set(jnp.cos(timesteps * div_term))
    return pe


def _gather_kernel(ts_ref, pe_hbm, out_ref, buf, sem):
    # ts_ref : SMEM int32 [B_pad]  -- scalar-prefetched, clamped timestep indices
    # pe_hbm : HBM  f32   [T, D]   -- raw ref (memory_space=pl.ANY), manual DMA
    # out_ref: VMEM f32   [R, D]   -- output block for this grid step
    # buf    : VMEM f32   [R, D]   -- DMA landing scratch
    # sem    : DMA semaphores [R]
    base = pl.program_id(0) * ROWS_PER_STEP

    # Issue all R row gathers first so their HBM latencies overlap.
    copies = []
    for r in range(ROWS_PER_STEP):          # static unroll (R is small)
        idx = ts_ref[base + r]              # dynamic scalar from SMEM
        cp = pltpu.make_async_copy(
            pe_hbm.at[pl.ds(idx, 1), :],    # (1, D) row in HBM
            buf.at[pl.ds(r, 1), :],         # (1, D) slot in VMEM scratch
            sem.at[r])
        cp.start()
        copies.append(cp)
    for cp in copies:
        cp.wait()

    # Single unmasked full-tile store (8 x 128 f32 = one vreg-aligned slab).
    out_ref[...] = buf[...]


def transformer_positional_embedding(pe_matrix: jnp.ndarray,
                                     timestep: jnp.ndarray) -> jnp.ndarray:
    """Pallas implementation of forward(timestep) == pe_matrix[timestep]."""
    assert timestep.ndim == 1, "expects a 1-D batch of timestep indices"
    B = timestep.shape[0]
    T, D = pe_matrix.shape
    R = ROWS_PER_STEP

    # Clamp (manual DMA has no bounds check) and pad B up to a multiple of 8
    # so every output block is a full-sublane tile; padded rows gather row 0
    # and are sliced away below.
    B_pad = ((B + R - 1) // R) * R
    ts = jnp.clip(timestep.astype(jnp.int32), 0, T - 1)
    ts = jnp.pad(ts, (0, B_pad - B))

    grid_spec = pltpu.PrefetchScalarGridSpec(
        num_scalar_prefetch=1,                    # timesteps land in SMEM
        grid=(B_pad // R,),
        in_specs=[
            pl.BlockSpec(memory_space=pl.ANY),    # pe table stays in HBM
        ],
        out_specs=pl.BlockSpec((R, D), lambda i, ts: (i, 0)),
        scratch_shapes=[
            pltpu.VMEM((R, D), pe_matrix.dtype),  # 8*128*4 B = 4 KiB
            pltpu.SemaphoreType.DMA((R,)),
        ],
    )

    out = pl.pallas_call(
        _gather_kernel,
        out_shape=jax.ShapeDtypeStruct((B_pad, D), pe_matrix.dtype),
        grid_spec=grid_spec,
        compiler_params=pltpu.CompilerParams(
            dimension_semantics=("parallel",)),   # distinct output block per step
    )(ts, pe_matrix)

    return out[:B]


if __name__ == "__main__":
    dimension = 128        # embedding dim (even, lane-aligned)
    max_timesteps = 10000  # module default
    batch = 13             # non-multiple of 8: exercises padding + 2 grid steps

    key = jax.random.PRNGKey(0)
    timestep = jax.random.randint(key, (batch,), 0, max_timesteps, dtype=jnp.int32)

    pe_matrix = build_pe_matrix(dimension, max_timesteps)

    out = transformer_positional_embedding(pe_matrix, timestep)
    out = jax.block_until_ready(out)

    # Reference: exactly what the PyTorch forward does.
    ref = pe_matrix[timestep]
    assert out.shape == (batch, dimension)
    assert out.dtype == jnp.float32
    assert jnp.array_equal(out, ref), "Pallas gather mismatch vs reference"

    print("KERNEL_OK")
</pallas_src>

<mosaic_0001>
module attributes {stable_mosaic.version = 11 : i64} {
  func.func @_gather_kernel(%arg0: i32, %arg1: memref<16xi32, #tpu.memory_space<smem>>, %arg2: memref<10000x128xf32, #tpu.memory_space<any>>, %arg3: memref<8x128xf32, #tpu.memory_space<vmem>>, %arg4: memref<8x128xf32, #tpu.memory_space<vmem>>, %arg5: memref<8x!tpu.dma_semaphore, #tpu.memory_space<semaphore_mem>>) attributes {dimension_semantics = [#tpu.dimension_semantics<parallel>], iteration_bounds = array<i64: 2>, scalar_prefetch = 1 : i64, scratch_operands = 2 : i64, tpu.core_type = #tpu.core_type<tc>, window_params = [{}, {transform_indices = @transform_1, window_bounds = array<i64: 8, 128>}]} {
    %c8_i32 = arith.constant 8 : i32
    %0 = arith.muli %arg0, %c8_i32 : i32
    %c0_i32 = arith.constant 0 : i32
    %1 = arith.addi %0, %c0_i32 : i32
    %2 = arith.index_cast %1 : i32 to index
    %3 = memref.load %arg1[%2] : memref<16xi32, #tpu.memory_space<smem>>
    %c0_i32_0 = arith.constant 0 : i32
    %c0_i32_1 = arith.constant 0 : i32
    %4 = tpu.memref_slice %arg2[%3, %c0_i32_1] : memref<10000x128xf32, #tpu.memory_space<any>> -> memref<1x128xf32, #tpu.memory_space<any>>
    %c0_i32_2 = arith.constant 0 : i32
    %c0_i32_3 = arith.constant 0 : i32
    %5 = tpu.memref_slice %arg4[%c0_i32_2, %c0_i32_3] : memref<8x128xf32, #tpu.memory_space<vmem>> -> memref<1x128xf32, #tpu.memory_space<vmem>>
    %6 = tpu.memref_slice %arg5[%c0_i32_0] : memref<8x!tpu.dma_semaphore, #tpu.memory_space<semaphore_mem>> -> memref<1x!tpu.dma_semaphore, #tpu.memory_space<semaphore_mem>>
    %7 = tpu.memref_squeeze %6 : memref<1x!tpu.dma_semaphore, #tpu.memory_space<semaphore_mem>> -> memref<!tpu.dma_semaphore, #tpu.memory_space<semaphore_mem>>
    tpu.enqueue_dma source(%4 : memref<1x128xf32, #tpu.memory_space<any>>) target(%5 : memref<1x128xf32, #tpu.memory_space<vmem>>) target_semaphore(%7 : memref<!tpu.dma_semaphore, #tpu.memory_space<semaphore_mem>>)
    %c1_i32 = arith.constant 1 : i32
    %8 = arith.addi %0, %c1_i32 : i32
    %9 = arith.index_cast %8 : i32 to index
    %10 = memref.load %arg1[%9] : memref<16xi32, #tpu.memory_space<smem>>
    %c1_i32_4 = arith.constant 1 : i32
    %c0_i32_5 = arith.constant 0 : i32
    %11 = tpu.memref_slice %arg2[%10, %c0_i32_5] : memref<10000x128xf32, #tpu.memory_space<any>> -> memref<1x128xf32, #tpu.memory_space<any>>
    %c1_i32_6 = arith.constant 1 : i32
    %c0_i32_7 = arith.constant 0 : i32
    %12 = tpu.memref_slice %arg4[%c1_i32_6, %c0_i32_7] : memref<8x128xf32, #tpu.memory_space<vmem>> -> memref<1x128xf32, #tpu.memory_space<vmem>>
    %13 = tpu.memref_slice %arg5[%c1_i32_4] : memref<8x!tpu.dma_semaphore, #tpu.memory_space<semaphore_mem>> -> memref<1x!tpu.dma_semaphore, #tpu.memory_space<semaphore_mem>>
    %14 = tpu.memref_squeeze %13 : memref<1x!tpu.dma_semaphore, #tpu.memory_space<semaphore_mem>> -> memref<!tpu.dma_semaphore, #tpu.memory_space<semaphore_mem>>
    tpu.enqueue_dma source(%11 : memref<1x128xf32, #tpu.memory_space<any>>) target(%12 : memref<1x128xf32, #tpu.memory_space<vmem>>) target_semaphore(%14 : memref<!tpu.dma_semaphore, #tpu.memory_space<semaphore_mem>>)
    %c2_i32 = arith.constant 2 : i32
    %15 = arith.addi %0, %c2_i32 : i32
    %16 = arith.index_cast %15 : i32 to index
    %17 = memref.load %arg1[%16] : memref<16xi32, #tpu.memory_space<smem>>
    %c2_i32_8 = arith.constant 2 : i32
    %c0_i32_9 = arith.constant 0 : i32
    %18 = tpu.memref_slice %arg2[%17, %c0_i32_9] : memref<10000x128xf32, #tpu.memory_space<any>> -> memref<1x128xf32, #tpu.memory_space<any>>
    %c2_i32_10 = arith.constant 2 : i32
    %c0_i32_11 = arith.constant 0 : i32
    %19 = tpu.memref_slice %arg4[%c2_i32_10, %c0_i32_11] : memref<8x128xf32, #tpu.memory_space<vmem>> -> memref<1x128xf32, #tpu.memory_space<vmem>>
    %20 = tpu.memref_slice %arg5[%c2_i32_8] : memref<8x!tpu.dma_semaphore, #tpu.memory_space<semaphore_mem>> -> memref<1x!tpu.dma_semaphore, #tpu.memory_space<semaphore_mem>>
    %21 = tpu.memref_squeeze %20 : memref<1x!tpu.dma_semaphore, #tpu.memory_space<semaphore_mem>> -> memref<!tpu.dma_semaphore, #tpu.memory_space<semaphore_mem>>
    tpu.enqueue_dma source(%18 : memref<1x128xf32, #tpu.memory_space<any>>) target(%19 : memref<1x128xf32, #tpu.memory_space<vmem>>) target_semaphore(%21 : memref<!tpu.dma_semaphore, #tpu.memory_space<semaphore_mem>>)
    %c3_i32 = arith.constant 3 : i32
    %22 = arith.addi %0, %c3_i32 : i32
    %23 = arith.index_cast %22 : i32 to index
    %24 = memref.load %arg1[%23] : memref<16xi32, #tpu.memory_space<smem>>
    %c3_i32_12 = arith.constant 3 : i32
    %c0_i32_13 = arith.constant 0 : i32
    %25 = tpu.memref_slice %arg2[%24, %c0_i32_13] : memref<10000x128xf32, #tpu.memory_space<any>> -> memref<1x128xf32, #tpu.memory_space<any>>
    %c3_i32_14 = arith.constant 3 : i32
    %c0_i32_15 = arith.constant 0 : i32
    %26 = tpu.memref_slice %arg4[%c3_i32_14, %c0_i32_15] : memref<8x128xf32, #tpu.memory_space<vmem>> -> memref<1x128xf32, #tpu.memory_space<vmem>>
    %27 = tpu.memref_slice %arg5[%c3_i32_12] : memref<8x!tpu.dma_semaphore, #tpu.memory_space<semaphore_mem>> -> memref<1x!tpu.dma_semaphore, #tpu.memory_space<semaphore_mem>>
    %28 = tpu.memref_squeeze %27 : memref<1x!tpu.dma_semaphore, #tpu.memory_space<semaphore_mem>> -> memref<!tpu.dma_semaphore, #tpu.memory_space<semaphore_mem>>
    tpu.enqueue_dma source(%25 : memref<1x128xf32, #tpu.memory_space<any>>) target(%26 : memref<1x128xf32, #tpu.memory_space<vmem>>) target_semaphore(%28 : memref<!tpu.dma_semaphore, #tpu.memory_space<semaphore_mem>>)
    %c4_i32 = arith.constant 4 : i32
    %29 = arith.addi %0, %c4_i32 : i32
    %30 = arith.index_cast %29 : i32 to index
    %31 = memref.load %arg1[%30] : memref<16xi32, #tpu.memory_space<smem>>
    %c4_i32_16 = arith.constant 4 : i32
    %c0_i32_17 = arith.constant 0 : i32
    %32 = tpu.memref_slice %arg2[%31, %c0_i32_17] : memref<10000x128xf32, #tpu.memory_space<any>> -> memref<1x128xf32, #tpu.memory_space<any>>
    %c4_i32_18 = arith.constant 4 : i32
    %c0_i32_19 = arith.constant 0 : i32
    %33 = tpu.memref_slice %arg4[%c4_i32_18, %c0_i32_19] : memref<8x128xf32, #tpu.memory_space<vmem>> -> memref<1x128xf32, #tpu.memory_space<vmem>>
    %34 = tpu.memref_slice %arg5[%c4_i32_16] : memref<8x!tpu.dma_semaphore, #tpu.memory_space<semaphore_mem>> -> memref<1x!tpu.dma_semaphore, #tpu.memory_space<semaphore_mem>>
    %35 = tpu.memref_squeeze %34 : memref<1x!tpu.dma_semaphore, #tpu.memory_space<semaphore_mem>> -> memref<!tpu.dma_semaphore, #tpu.memory_space<semaphore_mem>>
    tpu.enqueue_dma source(%32 : memref<1x128xf32, #tpu.memory_space<any>>) target(%33 : memref<1x128xf32, #tpu.memory_space<vmem>>) target_semaphore(%35 : memref<!tpu.dma_semaphore, #tpu.memory_space<semaphore_mem>>)
    %c5_i32 = arith.constant 5 : i32
    %36 = arith.addi %0, %c5_i32 : i32
    %37 = arith.index_cast %36 : i32 to index
    %38 = memref.load %arg1[%37] : memref<16xi32, #tpu.memory_space<smem>>
    %c5_i32_20 = arith.constant 5 : i32
    %c0_i32_21 = arith.constant 0 : i32
    %39 = tpu.memref_slice %arg2[%38, %c0_i32_21] : memref<10000x128xf32, #tpu.memory_space<any>> -> memref<1x128xf32, #tpu.memory_space<any>>
    %c5_i32_22 = arith.constant 5 : i32
    %c0_i32_23 = arith.constant 0 : i32
    %40 = tpu.memref_slice %arg4[%c5_i32_22, %c0_i32_23] : memref<8x128xf32, #tpu.memory_space<vmem>> -> memref<1x128xf32, #tpu.memory_space<vmem>>
    %41 = tpu.memref_slice %arg5[%c5_i32_20] : memref<8x!tpu.dma_semaphore, #tpu.memory_space<semaphore_mem>> -> memref<1x!tpu.dma_semaphore, #tpu.memory_space<semaphore_mem>>
    %42 = tpu.memref_squeeze %41 : memref<1x!tpu.dma_semaphore, #tpu.memory_space<semaphore_mem>> -> memref<!tpu.dma_semaphore, #tpu.memory_space<semaphore_mem>>
    tpu.enqueue_dma source(%39 : memref<1x128xf32, #tpu.memory_space<any>>) target(%40 : memref<1x128xf32, #tpu.memory_space<vmem>>) target_semaphore(%42 : memref<!tpu.dma_semaphore, #tpu.memory_space<semaphore_mem>>)
    %c6_i32 = arith.constant 6 : i32
    %43 = arith.addi %0, %c6_i32 : i32
    %44 = arith.index_cast %43 : i32 to index
    %45 = memref.load %arg1[%44] : memref<16xi32, #tpu.memory_space<smem>>
    %c6_i32_24 = arith.constant 6 : i32
    %c0_i32_25 = arith.constant 0 : i32
    %46 = tpu.memref_slice %arg2[%45, %c0_i32_25] : memref<10000x128xf32, #tpu.memory_space<any>> -> memref<1x128xf32, #tpu.memory_space<any>>
    %c6_i32_26 = arith.constant 6 : i32
    %c0_i32_27 = arith.constant 0 : i32
    %47 = tpu.memref_slice %arg4[%c6_i32_26, %c0_i32_27] : memref<8x128xf32, #tpu.memory_space<vmem>> -> memref<1x128xf32, #tpu.memory_space<vmem>>
    %48 = tpu.memref_slice %arg5[%c6_i32_24] : memref<8x!tpu.dma_semaphore, #tpu.memory_space<semaphore_mem>> -> memref<1x!tpu.dma_semaphore, #tpu.memory_space<semaphore_mem>>
    %49 = tpu.memref_squeeze %48 : memref<1x!tpu.dma_semaphore, #tpu.memory_space<semaphore_mem>> -> memref<!tpu.dma_semaphore, #tpu.memory_space<semaphore_mem>>
    tpu.enqueue_dma source(%46 : memref<1x128xf32, #tpu.memory_space<any>>) target(%47 : memref<1x128xf32, #tpu.memory_space<vmem>>) target_semaphore(%49 : memref<!tpu.dma_semaphore, #tpu.memory_space<semaphore_mem>>)
    %c7_i32 = arith.constant 7 : i32
    %50 = arith.addi %0, %c7_i32 : i32
    %51 = arith.index_cast %50 : i32 to index
    %52 = memref.load %arg1[%51] : memref<16xi32, #tpu.memory_space<smem>>
    %c7_i32_28 = arith.constant 7 : i32
    %c0_i32_29 = arith.constant 0 : i32
    %53 = tpu.memref_slice %arg2[%52, %c0_i32_29] : memref<10000x128xf32, #tpu.memory_space<any>> -> memref<1x128xf32, #tpu.memory_space<any>>
    %c7_i32_30 = arith.constant 7 : i32
    %c0_i32_31 = arith.constant 0 : i32
    %54 = tpu.memref_slice %arg4[%c7_i32_30, %c0_i32_31] : memref<8x128xf32, #tpu.memory_space<vmem>> -> memref<1x128xf32, #tpu.memory_space<vmem>>
    %55 = tpu.memref_slice %arg5[%c7_i32_28] : memref<8x!tpu.dma_semaphore, #tpu.memory_space<semaphore_mem>> -> memref<1x!tpu.dma_semaphore, #tpu.memory_space<semaphore_mem>>
    %56 = tpu.memref_squeeze %55 : memref<1x!tpu.dma_semaphore, #tpu.memory_space<semaphore_mem>> -> memref<!tpu.dma_semaphore, #tpu.memory_space<semaphore_mem>>
    tpu.enqueue_dma source(%53 : memref<1x128xf32, #tpu.memory_space<any>>) target(%54 : memref<1x128xf32, #tpu.memory_space<vmem>>) target_semaphore(%56 : memref<!tpu.dma_semaphore, #tpu.memory_space<semaphore_mem>>)
    %c0_i32_32 = arith.constant 0 : i32
    %c0_i32_33 = arith.constant 0 : i32
    %57 = tpu.memref_slice %arg2[%3, %c0_i32_33] : memref<10000x128xf32, #tpu.memory_space<any>> -> memref<1x128xf32, #tpu.memory_space<any>>
    %c0_i32_34 = arith.constant 0 : i32
    %c0_i32_35 = arith.constant 0 : i32
    %58 = tpu.memref_slice %arg4[%c0_i32_34, %c0_i32_35] : memref<8x128xf32, #tpu.memory_space<vmem>> -> memref<1x128xf32, #tpu.memory_space<vmem>>
    %59 = tpu.memref_slice %arg5[%c0_i32_32] : memref<8x!tpu.dma_semaphore, #tpu.memory_space<semaphore_mem>> -> memref<1x!tpu.dma_semaphore, #tpu.memory_space<semaphore_mem>>
    %60 = tpu.memref_squeeze %59 : memref<1x!tpu.dma_semaphore, #tpu.memory_space<semaphore_mem>> -> memref<!tpu.dma_semaphore, #tpu.memory_space<semaphore_mem>>
    tpu.wait_dma2 semaphore(%60 : memref<!tpu.dma_semaphore, #tpu.memory_space<semaphore_mem>>) src(%57 : memref<1x128xf32, #tpu.memory_space<any>>) dst(%58 : memref<1x128xf32, #tpu.memory_space<vmem>>)
    %c1_i32_36 = arith.constant 1 : i32
    %c0_i32_37 = arith.constant 0 : i32
    %61 = tpu.memref_slice %arg2[%10, %c0_i32_37] : memref<10000x128xf32, #tpu.memory_space<any>> -> memref<1x128xf32, #tpu.memory_space<any>>
    %c1_i32_38 = arith.constant 1 : i32
    %c0_i32_39 = arith.constant 0 : i32
    %62 = tpu.memref_slice %arg4[%c1_i32_38, %c0_i32_39] : memref<8x128xf32, #tpu.memory_space<vmem>> -> memref<1x128xf32, #tpu.memory_space<vmem>>
    %63 = tpu.memref_slice %arg5[%c1_i32_36] : memref<8x!tpu.dma_semaphore, #tpu.memory_space<semaphore_mem>> -> memref<1x!tpu.dma_semaphore, #tpu.memory_space<semaphore_mem>>
    %64 = tpu.memref_squeeze %63 : memref<1x!tpu.dma_semaphore, #tpu.memory_space<semaphore_mem>> -> memref<!tpu.dma_semaphore, #tpu.memory_space<semaphore_mem>>
    tpu.wait_dma2 semaphore(%64 : memref<!tpu.dma_semaphore, #tpu.memory_space<semaphore_mem>>) src(%61 : memref<1x128xf32, #tpu.memory_space<any>>) dst(%62 : memref<1x128xf32, #tpu.memory_space<vmem>>)
    %c2_i32_40 = arith.constant 2 : i32
    %c0_i32_41 = arith.constant 0 : i32
    %65 = tpu.memref_slice %arg2[%17, %c0_i32_41] : memref<10000x128xf32, #tpu.memory_space<any>> -> memref<1x128xf32, #tpu.memory_space<any>>
    %c2_i32_42 = arith.constant 2 : i32
    %c0_i32_43 = arith.constant 0 : i32
    %66 = tpu.memref_slice %arg4[%c2_i32_42, %c0_i32_43] : memref<8x128xf32, #tpu.memory_space<vmem>> -> memref<1x128xf32, #tpu.memory_space<vmem>>
    %67 = tpu.memref_slice %arg5[%c2_i32_40] : memref<8x!tpu.dma_semaphore, #tpu.memory_space<semaphore_mem>> -> memref<1x!tpu.dma_semaphore, #tpu.memory_space<semaphore_mem>>
    %68 = tpu.memref_squeeze %67 : memref<1x!tpu.dma_semaphore, #tpu.memory_space<semaphore_mem>> -> memref<!tpu.dma_semaphore, #tpu.memory_space<semaphore_mem>>
    tpu.wait_dma2 semaphore(%68 : memref<!tpu.dma_semaphore, #tpu.memory_space<semaphore_mem>>) src(%65 : memref<1x128xf32, #tpu.memory_space<any>>) dst(%66 : memref<1x128xf32, #tpu.memory_space<vmem>>)
    %c3_i32_44 = arith.constant 3 : i32
    %c0_i32_45 = arith.constant 0 : i32
    %69 = tpu.memref_slice %arg2[%24, %c0_i32_45] : memref<10000x128xf32, #tpu.memory_space<any>> -> memref<1x128xf32, #tpu.memory_space<any>>
    %c3_i32_46 = arith.constant 3 : i32
    %c0_i32_47 = arith.constant 0 : i32
    %70 = tpu.memref_slice %arg4[%c3_i32_46, %c0_i32_47] : memref<8x128xf32, #tpu.memory_space<vmem>> -> memref<1x128xf32, #tpu.memory_space<vmem>>
    %71 = tpu.memref_slice %arg5[%c3_i32_44] : memref<8x!tpu.dma_semaphore, #tpu.memory_space<semaphore_mem>> -> memref<1x!tpu.dma_semaphore, #tpu.memory_space<semaphore_mem>>
    %72 = tpu.memref_squeeze %71 : memref<1x!tpu.dma_semaphore, #tpu.memory_space<semaphore_mem>> -> memref<!tpu.dma_semaphore, #tpu.memory_space<semaphore_mem>>
    tpu.wait_dma2 semaphore(%72 : memref<!tpu.dma_semaphore, #tpu.memory_space<semaphore_mem>>) src(%69 : memref<1x128xf32, #tpu.memory_space<any>>) dst(%70 : memref<1x128xf32, #tpu.memory_space<vmem>>)
    %c4_i32_48 = arith.constant 4 : i32
    %c0_i32_49 = arith.constant 0 : i32
    %73 = tpu.memref_slice %arg2[%31, %c0_i32_49] : memref<10000x128xf32, #tpu.memory_space<any>> -> memref<1x128xf32, #tpu.memory_space<any>>
    %c4_i32_50 = arith.constant 4 : i32
    %c0_i32_51 = arith.constant 0 : i32
    %74 = tpu.memref_slice %arg4[%c4_i32_50, %c0_i32_51] : memref<8x128xf32, #tpu.memory_space<vmem>> -> memref<1x128xf32, #tpu.memory_space<vmem>>
    %75 = tpu.memref_slice %arg5[%c4_i32_48] : memref<8x!tpu.dma_semaphore, #tpu.memory_space<semaphore_mem>> -> memref<1x!tpu.dma_semaphore, #tpu.memory_space<semaphore_mem>>
    %76 = tpu.memref_squeeze %75 : memref<1x!tpu.dma_semaphore, #tpu.memory_space<semaphore_mem>> -> memref<!tpu.dma_semaphore, #tpu.memory_space<semaphore_mem>>
    tpu.wait_dma2 semaphore(%76 : memref<!tpu.dma_semaphore, #tpu.memory_space<semaphore_mem>>) src(%73 : memref<1x128xf32, #tpu.memory_space<any>>) dst(%74 : memref<1x128xf32, #tpu.memory_space<vmem>>)
    %c5_i32_52 = arith.constant 5 : i32
    %c0_i32_53 = arith.constant 0 : i32
    %77 = tpu.memref_slice %arg2[%38, %c0_i32_53] : memref<10000x128xf32, #tpu.memory_space<any>> -> memref<1x128xf32, #tpu.memory_space<any>>
    %c5_i32_54 = arith.constant 5 : i32
    %c0_i32_55 = arith.constant 0 : i32
    %78 = tpu.memref_slice %arg4[%c5_i32_54, %c0_i32_55] : memref<8x128xf32, #tpu.memory_space<vmem>> -> memref<1x128xf32, #tpu.memory_space<vmem>>
    %79 = tpu.memref_slice %arg5[%c5_i32_52] : memref<8x!tpu.dma_semaphore, #tpu.memory_space<semaphore_mem>> -> memref<1x!tpu.dma_semaphore, #tpu.memory_space<semaphore_mem>>
    %80 = tpu.memref_squeeze %79 : memref<1x!tpu.dma_semaphore, #tpu.memory_space<semaphore_mem>> -> memref<!tpu.dma_semaphore, #tpu.memory_space<semaphore_mem>>
    tpu.wait_dma2 semaphore(%80 : memref<!tpu.dma_semaphore, #tpu.memory_space<semaphore_mem>>) src(%77 : memref<1x128xf32, #tpu.memory_space<any>>) dst(%78 : memref<1x128xf32, #tpu.memory_space<vmem>>)
    %c6_i32_56 = arith.constant 6 : i32
    %c0_i32_57 = arith.constant 0 : i32
    %81 = tpu.memref_slice %arg2[%45, %c0_i32_57] : memref<10000x128xf32, #tpu.memory_space<any>> -> memref<1x128xf32, #tpu.memory_space<any>>
    %c6_i32_58 = arith.constant 6 : i32
    %c0_i32_59 = arith.constant 0 : i32
    %82 = tpu.memref_slice %arg4[%c6_i32_58, %c0_i32_59] : memref<8x128xf32, #tpu.memory_space<vmem>> -> memref<1x128xf32, #tpu.memory_space<vmem>>
    %83 = tpu.memref_slice %arg5[%c6_i32_56] : memref<8x!tpu.dma_semaphore, #tpu.memory_space<semaphore_mem>> -> memref<1x!tpu.dma_semaphore, #tpu.memory_space<semaphore_mem>>
    %84 = tpu.memref_squeeze %83 : memref<1x!tpu.dma_semaphore, #tpu.memory_space<semaphore_mem>> -> memref<!tpu.dma_semaphore, #tpu.memory_space<semaphore_mem>>
    tpu.wait_dma2 semaphore(%84 : memref<!tpu.dma_semaphore, #tpu.memory_space<semaphore_mem>>) src(%81 : memref<1x128xf32, #tpu.memory_space<any>>) dst(%82 : memref<1x128xf32, #tpu.memory_space<vmem>>)
    %c7_i32_60 = arith.constant 7 : i32
    %c0_i32_61 = arith.constant 0 : i32
    %85 = tpu.memref_slice %arg2[%52, %c0_i32_61] : memref<10000x128xf32, #tpu.memory_space<any>> -> memref<1x128xf32, #tpu.memory_space<any>>
    %c7_i32_62 = arith.constant 7 : i32
    %c0_i32_63 = arith.constant 0 : i32
    %86 = tpu.memref_slice %arg4[%c7_i32_62, %c0_i32_63] : memref<8x128xf32, #tpu.memory_space<vmem>> -> memref<1x128xf32, #tpu.memory_space<vmem>>
    %87 = tpu.memref_slice %arg5[%c7_i32_60] : memref<8x!tpu.dma_semaphore, #tpu.memory_space<semaphore_mem>> -> memref<1x!tpu.dma_semaphore, #tpu.memory_space<semaphore_mem>>
    %88 = tpu.memref_squeeze %87 : memref<1x!tpu.dma_semaphore, #tpu.memory_space<semaphore_mem>> -> memref<!tpu.dma_semaphore, #tpu.memory_space<semaphore_mem>>
    tpu.wait_dma2 semaphore(%88 : memref<!tpu.dma_semaphore, #tpu.memory_space<semaphore_mem>>) src(%85 : memref<1x128xf32, #tpu.memory_space<any>>) dst(%86 : memref<1x128xf32, #tpu.memory_space<vmem>>)
    %c0 = arith.constant 0 : index
    %c0_64 = arith.constant 0 : index
    %89 = vector.load %arg4[%c0, %c0_64] : memref<8x128xf32, #tpu.memory_space<vmem>>, vector<8x128xf32>
    %c0_65 = arith.constant 0 : index
    %c0_66 = arith.constant 0 : index
    %90 = vector.load %arg3[%c0_65, %c0_66] : memref<8x128xf32, #tpu.memory_space<vmem>>, vector<8x128xf32>
    tpu.vector_store %arg3[%c0_65, %c0_66], %89 {strides = array<i32>} : memref<8x128xf32, #tpu.memory_space<vmem>>, vector<8x128xf32>,
    return
  }
  func.func @transform_1(%arg0: i32, %arg1: memref<16xi32, #tpu.memory_space<smem>>) -> (i32, i32) {
    %c0_i32 = arith.constant 0 : i32
    %c0_i32_0 = arith.constant 0 : i32
    return %arg0, %c0_i32 : i32, i32
  }
}

</mosaic_0001>

<bundles_post_ra>
// kernel: tpu_custom_call.1
= control target key start
LH: loop header
LB: loop body
LE: loop exit
PB: predicated region body
PF: predicated region fallthrough
CT: control target
= control target key end

     0   :  { %s654_s9 = smov [#allocation5]   ;;  %s887_s0 = inlined_call_operand.hbm [shape: s32[16], index: 0, kind: input, shape index: {}]   ;;  %s888_s1 = inlined_call_operand.hbm [shape: f32[10000,128], index: 1, kind: input, shape index: {}]   ;;  %s889_s2 = inlined_call_operand.hbm [shape: f32[16,128], index: 2, kind: output, shape index: {}]  }
   0x1   :  { %8 = dma.hbm_to_smem %s887_s0, 16, %s654_s9, [#allocation4] }
   0x2   :  { %620 = dma.done.wait [#allocation4], 16 }
   0x3   :  { %621 = vsyncadd [#allocation4], 4294967280 }
   0x4   :  { %10 = sfence }
   0x5   :  { %11 = vsyncpa [#allocation7], 0 }
   0x6   :  { %13 = vsyncpa [#allocation7 + $0x1], 0  ;;  %s682_s12 = smov 0   ;;  %s684_s13 = smov 0  }
   0x7   :  { %s686_s14 = smov 0  }
   0x8 LB: > { %s333_s0 = sadd.s32 4294967295, %s652_s14   ;;  %s699_s15 = sadd.s32 1, %s652_s14   ;;  %s652_s14 = sphi %s686_s14, %s894_s14   ;;  %s648_s13 = sphi %s684_s13, %s893_s13   ;;  %s644_s12 = sphi %s682_s12, %s892_s12  }
   0x9   : > { %s22_s16 = ssub.s32 %s652_s14, %s699_s15  ;;  %s25_s17 = sadd.s32 1, %s648_s13 }
   0xa   : > { %p23_p0 = scmp.eq.s32.totalorder %s22_s16, 0  ;;  %p334_p1 = scmp.ne.s32.totalorder %s22_s16, 0 }
   0xb   : > { %p29_p2 = scmp.eq.s32.totalorder %s652_s14, 1  ;;  %p34_p3 = scmp.ne.s32.totalorder %s648_s13, %s644_s12 }
   0xc   : > { %s708_s18 = scalar_select %p23_p0, %s648_s13, %s25_s17  }
   0xd   : > { %p710_p4 = por %p334_p1, %p29_p2  ;;  %p35_p5 = scmp.eq.s32.totalorder %s333_s0, 1 }
   0xe   : > { %p335_p7 = scmp.ge.s32.totalorder %s652_s14, 2 }
   0xf   : > { %p714_p6 = por %p35_p5, %p34_p3  ;;  %s49_s21 = sand.u32 (!%p335_p7), 1, %s648_s13  }
  0x10   : > { %44 = sbr.rel (%p335_p7) target bundleno = 220 (0xdc), region = 12  ;;  %s721_s22 = sshll.u32 (!%p335_p7), %s652_s14, 3 }
  0x11   : > { %s725_s23 = sshll.u32 (!%p335_p7), %s49_s21, 3  ;;  %s53_s24 = sld [smem:[#allocation5 + %s721_s22]] (!%p335_p7) }
  0x12   : > { %s655_s25 = smov (!%p335_p7), [#allocation2]   ;;  %s67_s27 = sadd.s32 (!%p335_p7), 1, %s721_s22 }
  0x13   : > { %s63_s26 = sshll.u32 (!%p335_p7), %s655_s25, 4  ;;  %s731_s28 = sld [smem:[#allocation5 + %s67_s27]] (!%p335_p7)  ;;  %s729_s26 = int_to_ptr.vmem [resolvable:$true] %s63_s26 }
  0x14   : > { %s84_s29 = sadd.s32 (!%p335_p7), 2, %s721_s22  ;;  %s656_s30 = smov (!%p335_p7), [#allocation2 + $0x1]  }
  0x15   : > { %s80_s3 = sshll.u32 %s656_s30, 4  ;;  %s734_s4 = sld [smem:[#allocation5 + %s84_s29]]  ;;  %s736_s3 = int_to_ptr.vmem [resolvable:$true] %s80_s3 }
  0x16   : > { %s744_s0 = scalar_lea.hbm %s888_s1, 160000 }
  0x17   : > { %s338_s5 = sshll.u32 %s53_s24, 4 }
  0x18   : > { %s55_s8 = scalar_lea.hbm %s888_s1, %s338_s5 }
  0x19   : > { %s406_s9 = scalar_lea.hbm %s55_s8, 16  ;;  %p409_p9 = scmp.lt.s32.totalorder %s55_s8, %s888_s1 }
  0x1a   : > { %p407_p8 = scmp.ne.s32.totalorder %s55_s8, %s406_s9  ;;  %p410_p10 = scmp.lt.s32.totalorder %s744_s0, %s406_s9 }
  0x1c   : > { %p411_p11 = por %p410_p10, %p409_p9 }
  0x1e   : > { %p412_p12 = pnand %p411_p11, %p407_p8 }
  0x20   : > { %415 = shalt.err (!%p412_p12)  }
  0x21   : > { %s416_s24 = scalar_lea.vmem %s729_s26, 16  ;;  %s753_s25 = scalar_lea.vmem %s729_s26, 128 }
  0x22   : > { %p417_p13 = scmp.ne.s32.totalorder %s729_s26, %s416_s24  ;;  %p421_p0 = scmp.lt.s32.totalorder %s729_s26, %s729_s26 }
  0x23   : > { %p422_p1 = scmp.lt.s32.totalorder %s753_s25, %s416_s24 }
  0x25   : > { %p423_p2 = por %p422_p1, %p421_p0 }
  0x27   : > { %p424_p3 = pnand %p423_p2, %p417_p13 }
  0x29   : > { %427 = shalt.err (!%p424_p3)  }
  0x2a   : > { %66 = dma.hbm_to_vmem [thread:$0]  %s55_s8, 16, %s729_s26, [#allocation3] }
  0x2b   : > { %s339_s27 = sshll.u32 %s731_s28, 4  ;;  %s657_s29 = smov [#allocation2 + $0x2]  }
  0x2c   : > { %s97_s30 = sshll.u32 %s657_s29, 4  ;;  %s70_s7 = scalar_lea.hbm %s888_s1, %s339_s27  ;;  %s763_s30 = int_to_ptr.vmem [resolvable:$true] %s97_s30 }
  0x2d   : > { %s428_s9 = scalar_lea.hbm %s70_s7, 16  ;;  %p431_p7 = scmp.lt.s32.totalorder %s70_s7, %s888_s1 }
  0x2e   : > { %p429_p5 = scmp.ne.s32.totalorder %s70_s7, %s428_s9  ;;  %p432_p8 = scmp.lt.s32.totalorder %s744_s0, %s428_s9 }
  0x30   : > { %p433_p9 = por %p432_p8, %p431_p7 }
  0x32   : > { %p434_p10 = pnand %p433_p9, %p429_p5 }
  0x34   : > { %437 = shalt.err (!%p434_p10)  }
  0x35   : > { %s438_s28 = scalar_lea.vmem %s736_s3, 16  ;;  %p443_p12 = scmp.lt.s32.totalorder %s736_s3, %s729_s26 }
  0x36   : > { %p439_p11 = scmp.ne.s32.totalorder %s736_s3, %s438_s28  ;;  %p444_p13 = scmp.lt.s32.totalorder %s753_s25, %s438_s28 }
  0x38   : > { %p445_p0 = por %p444_p13, %p443_p12 }
  0x3a   : > { %p446_p1 = pnand %p445_p0, %p439_p11 }
  0x3c   : > { %449 = shalt.err (!%p446_p1)  }
  0x3d   : > { %83 = dma.hbm_to_vmem [thread:$0]  %s70_s7, 16, %s736_s3, [#allocation3 + $0x1] }
  0x3e   : > { %s340_s8 = sshll.u32 %s734_s4, 4  ;;  %s101_s16 = sadd.s32 3, %s721_s22 }
  0x3f   : > { %s87_s27 = scalar_lea.hbm %s888_s1, %s340_s8  ;;  %s102_s29 = sld [smem:[#allocation5 + %s101_s16]] }
  0x40   : > { %s450_s5 = scalar_lea.hbm %s87_s27, 16  ;;  %p453_p3 = scmp.lt.s32.totalorder %s87_s27, %s888_s1 }
  0x41   : > { %p451_p2 = scmp.ne.s32.totalorder %s87_s27, %s450_s5  ;;  %p454_p5 = scmp.lt.s32.totalorder %s744_s0, %s450_s5 }
  0x43   : > { %p455_p7 = por %p454_p5, %p453_p3 }
  0x45   : > { %p456_p8 = pnand %p455_p7, %p451_p2 }
  0x47   : > { %459 = shalt.err (!%p456_p8)  }
  0x48   : > { %s460_s3 = scalar_lea.vmem %s763_s30, 16  ;;  %p465_p10 = scmp.lt.s32.totalorder %s763_s30, %s729_s26 }
  0x49   : > { %p461_p9 = scmp.ne.s32.totalorder %s763_s30, %s460_s3  ;;  %p466_p11 = scmp.lt.s32.totalorder %s753_s25, %s460_s3 }
  0x4b   : > { %p467_p12 = por %p466_p11, %p465_p10 }
  0x4d   : > { %p468_p13 = pnand %p467_p12, %p461_p9 }
  0x4f   : > { %471 = shalt.err (!%p468_p13)  }
  0x50   : > { %100 = dma.hbm_to_vmem [thread:$0]  %s87_s27, 16, %s763_s30, [#allocation3 + $0x2] }
  0x51   : > { %s118_s4 = sadd.s32 4, %s721_s22  ;;  %s658_s7 = smov [#allocation2 + $0x3]  }
  0x52   : > { %s114_s10 = sshll.u32 %s658_s7, 4  ;;  %s119_s11 = sld [smem:[#allocation5 + %s118_s4]]  ;;  %s115_s10 = int_to_ptr.vmem [resolvable:$true] %s114_s10 }
  0x53   : > { %s659_s28 = smov [#allocation2 + $0x4]   ;;  %s135_s16 = sadd.s32 5, %s721_s22 }
  0x54   : > { %s131_s8 = sshll.u32 %s659_s28, 4  ;;  %s341_s17 = sshll.u32 %s102_s29, 4  ;;  %s792_s8 = int_to_ptr.vmem [resolvable:$true] %s131_s8 }
  0x55   : > { %s104_s6 = scalar_lea.hbm %s888_s1, %s341_s17  ;;  %s797_s9 = sld [smem:[#allocation5 + %s135_s16]] }
  0x56   : > { %s472_s3 = scalar_lea.hbm %s104_s6, 16  ;;  %p475_p1 = scmp.lt.s32.totalorder %s104_s6, %s888_s1 }
  0x57   : > { %p473_p0 = scmp.ne.s32.totalorder %s104_s6, %s472_s3  ;;  %p476_p2 = scmp.lt.s32.totalorder %s744_s0, %s472_s3 }
  0x59   : > { %p477_p3 = por %p476_p2, %p475_p1 }
  0x5b   : > { %p478_p5 = pnand %p477_p3, %p473_p0 }
  0x5d   : > { %481 = shalt.err (!%p478_p5)  }
  0x5e   : > { %s482_s4 = scalar_lea.vmem %s115_s10, 16  ;;  %p487_p8 = scmp.lt.s32.totalorder %s115_s10, %s729_s26 }
  0x5f   : > { %p483_p7 = scmp.ne.s32.totalorder %s115_s10, %s482_s4  ;;  %p488_p9 = scmp.lt.s32.totalorder %s753_s25, %s482_s4 }
  0x61   : > { %p489_p10 = por %p488_p9, %p487_p8 }
  0x63   : > { %p490_p11 = pnand %p489_p10, %p483_p7 }
  0x65   : > { %493 = shalt.err (!%p490_p11)  }
  0x66   : > { %117 = dma.hbm_to_vmem [thread:$0]  %s104_s6, 16, %s115_s10, [#allocation3 + $0x3] }
  0x67   : > { %s342_s29 = sshll.u32 %s119_s11, 4  ;;  %s660_s17 = smov [#allocation2 + $0x5]  }
  0x68   : > { %s121_s16 = scalar_lea.hbm %s888_s1, %s342_s29  ;;  %s148_s24 = sshll.u32 %s660_s17, 4  ;;  %s149_s24 = int_to_ptr.vmem [resolvable:$true] %s148_s24 }
  0x69   : > { %s494_s5 = scalar_lea.hbm %s121_s16, 16  ;;  %p497_p13 = scmp.lt.s32.totalorder %s121_s16, %s888_s1 }
  0x6a   : > { %p495_p12 = scmp.ne.s32.totalorder %s121_s16, %s494_s5  ;;  %p498_p0 = scmp.lt.s32.totalorder %s744_s0, %s494_s5 }
  0x6c   : > { %p499_p1 = por %p498_p0, %p497_p13 }
  0x6e   : > { %p500_p2 = pnand %p499_p1, %p495_p12 }
  0x70   : > { %503 = shalt.err (!%p500_p2)  }
  0x71   : > { %s504_s10 = scalar_lea.vmem %s792_s8, 16  ;;  %p509_p5 = scmp.lt.s32.totalorder %s792_s8, %s729_s26 }
  0x72   : > { %p505_p3 = scmp.ne.s32.totalorder %s792_s8, %s504_s10  ;;  %p510_p7 = scmp.lt.s32.totalorder %s753_s25, %s504_s10 }
  0x74   : > { %p511_p8 = por %p510_p7, %p509_p5 }
  0x76   : > { %p512_p9 = pnand %p511_p8, %p505_p3 }
  0x78   : > { %515 = shalt.err (!%p512_p9)  }
  0x79   : > { %134 = dma.hbm_to_vmem [thread:$0]  %s121_s16, 16, %s792_s8, [#allocation3 + $0x4] }
  0x7a   : > { %s152_s11 = sadd.s32 6, %s721_s22  ;;  %s343_s6 = sshll.u32 %s797_s9, 4 }
  0x7b   : > { %s153_s27 = sld [smem:[#allocation5 + %s152_s11]]  ;;  %s138_s7 = scalar_lea.hbm %s888_s1, %s343_s6 }
  0x7c   : > { %s516_s28 = scalar_lea.hbm %s138_s7, 16  ;;  %p519_p11 = scmp.lt.s32.totalorder %s138_s7, %s888_s1 }
  0x7d   : > { %p517_p10 = scmp.ne.s32.totalorder %s138_s7, %s516_s28  ;;  %p520_p12 = scmp.lt.s32.totalorder %s744_s0, %s516_s28 }
  0x7f   : > { %p521_p13 = por %p520_p12, %p519_p11 }
  0x81   : > { %p522_p0 = pnand %p521_p13, %p517_p10 }
  0x83   : > { %525 = shalt.err (!%p522_p0)  }
  0x84   : > { %s526_s3 = scalar_lea.vmem %s149_s24, 16  ;;  %p531_p2 = scmp.lt.s32.totalorder %s149_s24, %s729_s26 }
  0x85   : > { %p527_p1 = scmp.ne.s32.totalorder %s149_s24, %s526_s3  ;;  %p532_p3 = scmp.lt.s32.totalorder %s753_s25, %s526_s3 }
  0x87   : > { %p533_p5 = por %p532_p3, %p531_p2 }
  0x89   : > { %p534_p7 = pnand %p533_p5, %p527_p1 }
  0x8b   : > { %537 = shalt.err (!%p534_p7)  }
  0x8c   : > { %151 = dma.hbm_to_vmem [thread:$0]  %s138_s7, 16, %s149_s24, [#allocation3 + $0x5] }
  0x8d   : > { %s661_s8 = smov [#allocation2 + $0x6]   ;;  %s169_s16 = sadd.s32 7, %s721_s22 }
  0x8e   : > { %s165_s9 = sshll.u32 %s661_s8, 4  ;;  %s170_s30 = sld [smem:[#allocation5 + %s169_s16]]  ;;  %s166_s9 = int_to_ptr.vmem [resolvable:$true] %s165_s9 }
  0x8f   : > { %s344_s10 = sshll.u32 %s153_s27, 4  ;;  %s662_s11 = smov [#allocation2 + $0x7]  }
  0x90   : > { %s182_s6 = sshll.u32 %s662_s11, 4  ;;  %s155_s28 = scalar_lea.hbm %s888_s1, %s344_s10  ;;  %s183_s6 = int_to_ptr.vmem [resolvable:$true] %s182_s6 }
  0x91   : > { %s538_s17 = scalar_lea.hbm %s155_s28, 16  ;;  %p541_p9 = scmp.lt.s32.totalorder %s155_s28, %s888_s1 }
  0x92   : > { %p539_p8 = scmp.ne.s32.totalorder %s155_s28, %s538_s17  ;;  %p542_p10 = scmp.lt.s32.totalorder %s744_s0, %s538_s17 }
  0x94   : > { %p543_p11 = por %p542_p10, %p541_p9 }
  0x96   : > { %p544_p12 = pnand %p543_p11, %p539_p8 }
  0x98   : > { %547 = shalt.err (!%p544_p12)  }
  0x99   : > { %s548_s22 = scalar_lea.vmem %s166_s9, 16  ;;  %p553_p0 = scmp.lt.s32.totalorder %s166_s9, %s729_s26 }
  0x9a   : > { %p549_p13 = scmp.ne.s32.totalorder %s166_s9, %s548_s22  ;;  %p554_p1 = scmp.lt.s32.totalorder %s753_s25, %s548_s22 }
  0x9c   : > { %p555_p2 = por %p554_p1, %p553_p0 }
  0x9e   : > { %p556_p3 = pnand %p555_p2, %p549_p13 }
  0xa0   : > { %559 = shalt.err (!%p556_p3)  }
  0xa1   : > { %168 = dma.hbm_to_vmem [thread:$0]  %s155_s28, 16, %s166_s9, [#allocation3 + $0x6] }
  0xa2   : > { %s345_s24 = sshll.u32 %s170_s30, 4 }
  0xa3   : > { %s172_s8 = scalar_lea.hbm %s888_s1, %s345_s24 }
  0xa4   : > { %s560_s16 = scalar_lea.hbm %s172_s8, 16  ;;  %p563_p7 = scmp.lt.s32.totalorder %s172_s8, %s888_s1 }
  0xa5   : > { %p561_p5 = scmp.ne.s32.totalorder %s172_s8, %s560_s16  ;;  %p564_p8 = scmp.lt.s32.totalorder %s744_s0, %s560_s16 }
  0xa7   : > { %p565_p9 = por %p564_p8, %p563_p7 }
  0xa9   : > { %p566_p10 = pnand %p565_p9, %p561_p5 }
  0xab   : > { %569 = shalt.err (!%p566_p10)  }
  0xac   : > { %s570_s4 = scalar_lea.vmem %s183_s6, 16  ;;  %p575_p12 = scmp.lt.s32.totalorder %s183_s6, %s729_s26 }
  0xad   : > { %p571_p11 = scmp.ne.s32.totalorder %s183_s6, %s570_s4  ;;  %p576_p13 = scmp.lt.s32.totalorder %s753_s25, %s570_s4 }
  0xaf   : > { %p577_p0 = por %p576_p13, %p575_p12 }
  0xb1   : > { %p578_p1 = pnand %p577_p0, %p571_p11 }
  0xb3   : > { %581 = shalt.err (!%p578_p1)  }
  0xb4   : > { %185 = dma.hbm_to_vmem [thread:$0]  %s172_s8, 16, %s183_s6, [#allocation3 + $0x7] }
  0xb5   : > { %s51_s9 = scalar_lea.vmem [#allocation6], %s725_s23 }
  0xb6   : > { %622 = dma.done.wait [#allocation3], 16 }
  0xb7   : > { %623 = vsyncadd [#allocation3], 4294967280 }
  0xb8   : > { %624 = dma.done.wait [#allocation3 + $0x1], 16 }
  0xb9   : > { %625 = vsyncadd [#allocation3 + $0x1], 4294967280 }
  0xba   : > { %626 = dma.done.wait [#allocation3 + $0x2], 16 }
  0xbb   : > { %627 = vsyncadd [#allocation3 + $0x2], 4294967280 }
  0xbc   : > { %628 = dma.done.wait [#allocation3 + $0x3], 16 }
  0xbd   : > { %629 = vsyncadd [#allocation3 + $0x3], 4294967280 }
  0xbe   : > { %630 = dma.done.wait [#allocation3 + $0x4], 16 }
  0xbf   : > { %631 = vsyncadd [#allocation3 + $0x4], 4294967280 }
  0xc0   : > { %632 = dma.done.wait [#allocation3 + $0x5], 16 }
  0xc1   : > { %633 = vsyncadd [#allocation3 + $0x5], 4294967280 }
  0xc2   : > { %634 = dma.done.wait [#allocation3 + $0x6], 16 }
  0xc3   : > { %635 = vsyncadd [#allocation3 + $0x6], 4294967280 }
  0xc4   : > { %636 = dma.done.wait [#allocation3 + $0x7], 16 }
  0xc5   : > { %637 = vsyncadd [#allocation3 + $0x7], 4294967280  ;;  %s347_s23 = sshll.u32 %s652_s14, 7  ;;  %s219_s26 = sshll.u32 %s51_s9, 4  ;;  %v203_v0 = vld [vmem:[#allocation2] sm:$0xff]  ;;  %s220_s26 = int_to_ptr.vmem [resolvable:$true] %s219_s26 }
  0xc6   : > { %s853_s30 = scalar_lea.hbm %s889_s2, %s347_s23  ;;  %204 = vst [vmem:[%s51_s9] sm:$0xff] %v203_v0  ;;  %s206_s6 = scalar_lea.sflag [#allocation7], %s49_s21 }
  0xc7   : > { %s582_s29 = scalar_lea.vmem %s220_s26, 128  ;;  %s663_s28 = smov [#allocation6]  }
  0xc8   : > { %p583_p2 = scmp.ne.s32.totalorder %s220_s26, %s582_s29  ;;  %s586_s17 = sshll.u32 %s663_s28, 4  ;;  %s587_s17 = int_to_ptr.vmem [resolvable:$false] %s586_s17 }
  0xc9   : > { %s588_s5 = scalar_lea.vmem %s587_s17, 256  ;;  %p589_p7 = scmp.lt.s32.totalorder %s220_s26, %s587_s17 }
  0xca   : > { %p584_p3 = pnand %p583_p2, %p710_p4  ;;  %p590_p8 = scmp.lt.s32.totalorder %s588_s5, %s582_s29 }
  0xcc   : > { %p585_p5 = pneg %p584_p3  ;;  %p591_p9 = por %p590_p8, %p589_p7 }
  0xce   : > { %p592_p10 = pnand %p591_p9, %p585_p5 }
  0xd0   : > { %595 = shalt.err (!%p592_p10)
}
  0xd1   : > { %s596_s3 = scalar_lea.hbm %s853_s30, 128  ;;  %s600_s24 = scalar_lea.hbm %s889_s2, 256 }
  0xd2   : > { %p597_p11 = scmp.ne.s32.totalorder %s853_s30, %s596_s3  ;;  %p601_p0 = scmp.lt.s32.totalorder %s853_s30, %s889_s2 }
  0xd3   : > { %p602_p1 = scmp.lt.s32.totalorder %s600_s24, %s596_s3 }
  0xd4   : > { %p598_p12 = pnand %p597_p11, %p710_p4 }
  0xd5   : > { %p603_p2 = por %p602_p1, %p601_p0 }
  0xd6   : > { %p599_p13 = pneg %p598_p12 }
  0xd8   : > { %p604_p3 = pnand %p603_p2, %p599_p13 }
  0xda   : > { %607 = shalt.err (!%p604_p3)
}
  0xdb   : > { %358 = dma.vmem_to_hbm [thread:$0]  (%p710_p4), %s220_s26, 128, %s853_s30, %s206_s6  }
  0xdc PF: > { %p364_p5 = scmp.ge.s32.totalorder %s652_s14, 1  ;;  %s231_s8 = sand.u32 1, %s644_s12  }
  0xdd   : > { %s232_s16 = scalar_lea.sflag [#allocation7], %s231_s8 }
  0xde   : > { %p361_p7 = pnand %p364_p5, %p714_p6 }
  0xe0   : > { %p362_p8 = pneg %p361_p7 }
  0xe2   : > { %639 = dma.done.wait (%p362_p8), %s232_s16, 128  }
  0xe3   : > { %641 = vsyncadd (%p362_p8), %s232_s16, 4294967168  ;;  %p16_p9 = scmp.ge.s32.totalorder %s699_s15, 3   ;;  %s892_s12 = smov %s648_s13 }
  0xe4   : > { %s893_s13 = smov %s708_s18  ;;  %s894_s14 = smov %s699_s15 }
  0xe5   :  { %18 = sbr.rel (!%p16_p9) target bundleno = 8 (0x8), region = 105 }
  0xea   :  { %237 = vsyncpa [#allocation7], 1 }
  0xeb   :  { %239 = vsyncpa [#allocation7 + $0x1], 1 }
  0xec   :  { %240 = vsyncmov [#allocation3] }
  0xef   :  { %s241_s14 = vpop.sfrf %240 }
  0xf0   :  { %p350_p4 = scmp.ne.s32.totalorder %s241_s14, 0 }
  0xf2   :  { %245 = shalt.err (%p350_p4)  }
  0xf3   :  { %247 = vsyncmov [#allocation3 + $0x1] }
  0xf6   :  { %s248_s19 = vpop.sfrf %247 }
  0xf7   :  { %p351_p6 = scmp.ne.s32.totalorder %s248_s19, 0 }
  0xf9   :  { %252 = shalt.err (%p351_p6)  }
  0xfa   :  { %254 = vsyncmov [#allocation3 + $0x2] }
  0xfd   :  { %s255_s20 = vpop.sfrf %254 }
  0xfe   :  { %p352_p10 = scmp.ne.s32.totalorder %s255_s20, 0 }
 0x100   :  { %259 = shalt.err (%p352_p10)  }
 0x101   :  { %261 = vsyncmov [#allocation3 + $0x3] }
 0x104   :  { %s262_s10 = vpop.sfrf %261 }
 0x105   :  { %p353_p11 = scmp.ne.s32.totalorder %s262_s10, 0 }
 0x107   :  { %266 = shalt.err (%p353_p11)  }
 0x108   :  { %268 = vsyncmov [#allocation3 + $0x4] }
 0x10b   :  { %s269_s15 = vpop.sfrf %268 }
 0x10c   :  { %p354_p12 = scmp.ne.s32.totalorder %s269_s15, 0 }
 0x10e   :  { %273 = shalt.err (%p354_p12)  }
 0x10f   :  { %275 = vsyncmov [#allocation3 + $0x5] }
 0x112   :  { %s276_s1 = vpop.sfrf %275 }
 0x113   :  { %p355_p13 = scmp.ne.s32.totalorder %s276_s1, 0 }
 0x115   :  { %280 = shalt.err (%p355_p13)  }
 0x116   :  { %282 = vsyncmov [#allocation3 + $0x6] }
 0x119   :  { %s283_s2 = vpop.sfrf %282 }
 0x11a   :  { %p356_p0 = scmp.ne.s32.totalorder %s283_s2, 0 }
 0x11c   :  { %287 = shalt.err (%p356_p0)  }
 0x11d   :  { %289 = vsyncmov [#allocation3 + $0x7] }
 0x120   :  { %s290_s12 = vpop.sfrf %289 }
 0x121   :  { %p357_p1 = scmp.ne.s32.totalorder %s290_s12, 0 }
 0x123   :  { %294 = shalt.err (%p357_p1)  }

</bundles_post_ra>
